<compile_context>
chip_gen: v7x
topology: tpu7x:2x2x1
jax: 0.10.0
libtpu: 0.0.40
codegen_flags: <defaults>
</compile_context>

<pallas_src>
import numpy as np

import jax
import jax.numpy as jnp
from jax.experimental import pallas as pl
from jax.experimental.pallas import tpu as pltpu


OUT_PIXEL = 2                     # fc_pixel width
OUT_ANGLE = 4                     # fc_angle width
OUT_USED = OUT_PIXEL + OUT_ANGLE  # 6
OUT_PAD = 128                     # lane-dense padded output width
OUT_ROWS = 8                      # sublane-dense padded output rows per pair


def _ru8(v):
    return (v + 7) // 8 * 8


def _pick_tile(hw, max_tile=2048):
    """Pixel-tile width: whole row if small, else a 128-multiple divisor of HW."""
    if hw <= max_tile:
        return hw
    for t in range(max_tile - (max_tile % 128), 127, -128):
        if hw % t == 0:
            return t
    return hw  # TODO(synk): irregular HW falls back to a single whole-row tile.


def _vmem_limit(c, tile, l, rows):
    f32 = 4
    cp, lp, rp = _ru8(c), _ru8(l), _ru8(rows)
    x_bufs = 2 * 2 * cp * tile * f32          # two image inputs, double-buffered
    slab_buf = 2 * rp * OUT_PAD * f32         # resident weight slab
    out_buf = 2 * OUT_ROWS * OUT_PAD * f32
    scratch = 2 * lp * tile * f32             # acc1 / acc2
    live = 2 * lp * tile * f32                # h1 / h2 temporaries
    total = x_bufs + slab_buf + out_buf + scratch + live
    return int(min(max(2 * total + (1 << 20), 4 << 20), 32 << 20))


def _make_kernel(c, l, inv_hw, r_conv, r_wtop, r_wbot, r_bias):
    """Fused PolicyNet kernel for static sizes / slab row offsets."""

    def kernel(x1_ref, x2_ref, w_ref, out_ref, acc1_ref, acc2_ref):
        # x1_ref/x2_ref: (1, C, T)  channel-major pixel tile of image pair i
        # w_ref:         (ROWS, 128) packed weight slab (resident across grid)
        # out_ref:       (1, 8, 128) one padded output row per pair
        # acc1/acc2:     (L, T)     running sums of relu(conv) over pixel tiles
        k = pl.program_id(1)

        @pl.when(k == 0)
        def _():
            acc1_ref[...] = jnp.zeros_like(acc1_ref)
            acc2_ref[...] = jnp.zeros_like(acc2_ref)

        # Synthetic stem (1x1 conv + ReLU), canonical (L,C)@(C,T) matmuls.
        w_conv_t = w_ref[r_conv:r_conv + l, 0:c]                      # (L, C)
        acc1_ref[...] += jnp.maximum(
            jnp.dot(w_conv_t, x1_ref[0], preferred_element_type=jnp.float32), 0.0)
        acc2_ref[...] += jnp.maximum(
            jnp.dot(w_conv_t, x2_ref[0], preferred_element_type=jnp.float32), 0.0)

        # Last pixel tile: global average pool + fused affine head.
        @pl.when(k == pl.num_programs(1) - 1)
        def _():
            s1 = jnp.sum(acc1_ref[...], axis=1, keepdims=True)        # (L, 1)
            s2 = jnp.sum(acc2_ref[...], axis=1, keepdims=True)        # (L, 1)
            w_top = w_ref[r_wtop:r_wtop + l, :]                       # (L, 128)
            w_bot = w_ref[r_wbot:r_wbot + l, :]                       # (L, 128)
            out_row = (jnp.sum(s1 * w_top, axis=0, keepdims=True)
                       + jnp.sum(s2 * w_bot, axis=0, keepdims=True)) * inv_hw
            out_row = out_row + w_ref[r_bias:r_bias + 1, :]           # (1, 128)
            out_ref[...] = jnp.broadcast_to(out_row, out_ref.shape).astype(out_ref.dtype)

    return kernel


def _fuse_and_pack(params):
    """Collapse the all-affine head (f64 on host) and pack one weight slab."""
    p = {k: np.asarray(jax.device_get(v), dtype=np.float64) for k, v in params.items()}
    c, l = p["w_conv"].shape
    assert c <= OUT_PAD and OUT_USED <= OUT_PAD

    # fc_pixel / fc_angle side by side -> one (200, 6) head.
    w_head = np.concatenate([p["w_pixel"], p["w_angle"]], axis=1)
    b_head = np.concatenate([p["b_pixel"], p["b_angle"]], axis=1)

    # ((cat(f1,f2) @ w1 + b1) @ w2 + b2) @ w_head + b_head, collapsed:
    w12h = p["w1"] @ (p["w2"] @ w_head)                               # (400, 6)
    w12h_top, w12h_bot = w12h[:200], w12h[200:]
    wf_top = p["w_stem"] @ w12h_top                                   # (L, 6)
    wf_bot = p["w_stem"] @ w12h_bot                                   # (L, 6)
    b_fused = (p["b_stem"] @ (w12h_top + w12h_bot)
               + (p["b1"] @ p["w2"] + p["b2"]) @ w_head
               + b_head)                                              # (1, 6)

    r_conv = 0
    r_wtop = _ru8(r_conv + l)
    r_wbot = _ru8(r_wtop + l)
    r_bias = _ru8(r_wbot + l)
    rows = _ru8(r_bias + 1)

    slab = np.zeros((rows, OUT_PAD), np.float64)
    slab[r_conv:r_conv + l, 0:c] = p["w_conv"].T
    slab[r_wtop:r_wtop + l, 0:OUT_USED] = wf_top
    slab[r_wbot:r_wbot + l, 0:OUT_USED] = wf_bot
    slab[r_bias, 0:OUT_USED] = b_fused[0]
    return jnp.asarray(slab, jnp.float32), l, (r_conv, r_wtop, r_wbot, r_bias)


def _forward_impl(x1_nchw, x2_nchw, slab, l, offs):
    n, c, h, w = x1_nchw.shape
    hw = h * w
    tile = _pick_tile(hw)
    kt = hw // tile
    rows = slab.shape[0]

    # (N, C, H, W) -> (N, C, HW): contiguous reshape, no HBM relayout.
    x1 = x1_nchw.reshape(n, c, hw)
    x2 = x2_nchw.reshape(n, c, hw)

    kernel = _make_kernel(c, l, 1.0 / hw, *offs)

    flops = (2 * 2 * n * hw * l * c          # 1x1 conv (both images)
             + 2 * n * hw * l                # pooled accumulation
             + 2 * 2 * n * l * OUT_PAD)      # fused head
    bytes_accessed = 4 * (2 * n * c * hw + slab.size + n * OUT_ROWS * OUT_PAD)

    out = pl.pallas_call(
        kernel,
        out_shape=jax.ShapeDtypeStruct((n, OUT_ROWS, OUT_PAD), jnp.float32),
        grid=(n, kt),
        in_specs=[
            pl.BlockSpec((1, c, tile), lambda i, k: (i, 0, k)),
            pl.BlockSpec((1, c, tile), lambda i, k: (i, 0, k)),
            pl.BlockSpec((rows, OUT_PAD), lambda i, k: (0, 0)),
        ],
        out_specs=pl.BlockSpec((1, OUT_ROWS, OUT_PAD), lambda i, k: (i, 0, 0)),
        scratch_shapes=[pltpu.VMEM((l, tile), jnp.float32),
                        pltpu.VMEM((l, tile), jnp.float32)],
        compiler_params=pltpu.CompilerParams(
            dimension_semantics=("parallel", "arbitrary"),
            vmem_limit_bytes=_vmem_limit(c, tile, l, rows)),
        cost_estimate=pl.CostEstimate(flops=flops, transcendentals=0,
                                      bytes_accessed=bytes_accessed),
    )(x1, x2, slab)

    return out[:, 0, :OUT_PIXEL], out[:, 0, OUT_PIXEL:OUT_USED]


def make_policy_net_forward(params):
    """One-time host-side weight fusion + packing; returns a jitted forward."""
    slab, l, offs = _fuse_and_pack(params)

    def fwd(x1_nchw, x2_nchw):
        return _forward_impl(x1_nchw, x2_nchw, slab, l, offs)

    return jax.jit(fwd)


def make_params(key, c, num_latent):
    keys = jax.random.split(key, 12)

    def lin(k, fan_in, fan_out):
        scale = 1.0 / jnp.sqrt(jnp.float32(fan_in))
        return jax.random.uniform(k, (fan_in, fan_out), jnp.float32,
                                  minval=-scale, maxval=scale)

    def bias(k, fan_in, fan_out):
        scale = 1.0 / jnp.sqrt(jnp.float32(fan_in))
        return jax.random.uniform(k, (1, fan_out), jnp.float32,
                                  minval=-scale, maxval=scale)

    return {
        "w_conv":  lin(keys[0], c, num_latent),
        "w_stem":  lin(keys[1], num_latent, 200),
        "b_stem":  bias(keys[2], num_latent, 200),
        "w1":      lin(keys[3], 400, 200),
        "b1":      bias(keys[4], 400, 200),
        "w2":      lin(keys[5], 200, 200),
        "b2":      bias(keys[6], 200, 200),
        "w_pixel": lin(keys[7], 200, 2),
        "b_pixel": bias(keys[8], 200, 2),
        "w_angle": lin(keys[9], 200, 4),
        "b_angle": bias(keys[10], 200, 4),
    }


def reference_forward(x1_nchw, x2_nchw, p):
    """Pure-JAX reference (un-fused, mirrors the PyTorch forward exactly)."""
    def stem(x_nchw):
        n, c, h, w = x_nchw.shape
        x = jnp.transpose(x_nchw, (0, 2, 3, 1)).reshape(n * h * w, c)
        hdn = jnp.maximum(x @ p["w_conv"], 0.0).reshape(n, h * w, -1)
        f = jnp.mean(hdn, axis=1)
        return f @ p["w_stem"] + p["b_stem"]

    x = jnp.concatenate([stem(x1_nchw), stem(x2_nchw)], axis=1)
    x = x @ p["w1"] + p["b1"]
    x = x @ p["w2"] + p["b2"]
    return x @ p["w_pixel"] + p["b_pixel"], x @ p["w_angle"] + p["b_angle"]


if __name__ == "__main__":
    N, C, H, W = 2, 4, 16, 16      # small NCHW images, like the PyTorch input
    NUM_LATENT = 32                # model.fc.in_features of the synthetic stem

    key = jax.random.PRNGKey(0)
    k_x1, k_x2, k_p = jax.random.split(key, 3)
    x1 = jax.random.normal(k_x1, (N, C, H, W), jnp.float32)
    x2 = jax.random.normal(k_x2, (N, C, H, W), jnp.float32)
    params = make_params(k_p, C, NUM_LATENT)

    forward = make_policy_net_forward(params)   # fusion/packing hoisted to init
    x_pixel, x_angle = jax.block_until_ready(forward(x1, x2))

    assert x_pixel.shape == (N, 2) and x_angle.shape == (N, 4)

    ref_pixel, ref_angle = reference_forward(x1, x2, params)
    assert jnp.allclose(x_pixel, ref_pixel, atol=1e-4, rtol=1e-4)
    assert jnp.allclose(x_angle, ref_angle, atol=1e-4, rtol=1e-4)

    print("KERNEL_OK")
</pallas_src>

<mosaic_0001>
module attributes {stable_mosaic.version = 11 : i64} {
  func.func @kernel(%arg0: i32, %arg1: i32, %arg2: memref<1x4x256xf32, #tpu.memory_space<vmem>>, %arg3: memref<1x4x256xf32, #tpu.memory_space<vmem>>, %arg4: memref<104x128xf32, #tpu.memory_space<vmem>>, %arg5: memref<1x8x128xf32, #tpu.memory_space<vmem>>, %arg6: memref<32x256xf32, #tpu.memory_space<vmem>>, %arg7: memref<32x256xf32, #tpu.memory_space<vmem>>) attributes {dimension_semantics = [#tpu.dimension_semantics<parallel>, #tpu.dimension_semantics<arbitrary>], iteration_bounds = array<i64: 2, 1>, scalar_prefetch = 0 : i64, scratch_operands = 2 : i64, tpu.core_type = #tpu.core_type<tc>, window_params = [{transform_indices = @transform_0, window_bounds = array<i64: 1, 4, 256>}, {transform_indices = @transform_1, window_bounds = array<i64: 1, 4, 256>}, {pipeline_mode = #tpu.pipeline_mode<synchronous>, transform_indices = @transform_2, window_bounds = array<i64: 104, 128>}, {transform_indices = @transform_3, window_bounds = array<i64: 1, 8, 128>}]} {
    %c0_i32 = arith.constant 0 : i32
    %0 = arith.cmpi eq, %arg1, %c0_i32 : i32
    %1 = arith.extui %0 : i1 to i32
    %c0_i32_0 = arith.constant 0 : i32
    %2 = arith.cmpi ne, %1, %c0_i32_0 : i32
    scf.if %2 {
      %cst_21 = arith.constant 0.000000e+00 : f32
      %23 = vector.broadcast %cst_21 : f32 to vector<32x256xf32>
      %c0_22 = arith.constant 0 : index
      %c0_23 = arith.constant 0 : index
      %24 = vector.load %arg6[%c0_22, %c0_23] : memref<32x256xf32, #tpu.memory_space<vmem>>, vector<32x256xf32>
      tpu.vector_store %arg6[%c0_22, %c0_23], %23 {strides = array<i32>} : memref<32x256xf32, #tpu.memory_space<vmem>>, vector<32x256xf32>,
      %cst_24 = arith.constant 0.000000e+00 : f32
      %25 = vector.broadcast %cst_24 : f32 to vector<32x256xf32>
      %c0_25 = arith.constant 0 : index
      %c0_26 = arith.constant 0 : index
      %26 = vector.load %arg7[%c0_25, %c0_26] : memref<32x256xf32, #tpu.memory_space<vmem>>, vector<32x256xf32>
      tpu.vector_store %arg7[%c0_25, %c0_26], %25 {strides = array<i32>} : memref<32x256xf32, #tpu.memory_space<vmem>>, vector<32x256xf32>,
    } else {
    }
    %c0 = arith.constant 0 : index
    %c0_1 = arith.constant 0 : index
    %3 = vector.load %arg4[%c0, %c0_1] : memref<104x128xf32, #tpu.memory_space<vmem>>, vector<32x4xf32>
    %c0_2 = arith.constant 0 : index
    %c0_3 = arith.constant 0 : index
    %4 = vector.load %arg6[%c0_2, %c0_3] : memref<32x256xf32, #tpu.memory_space<vmem>>, vector<32x256xf32>
    %c0_4 = arith.constant 0 : index
    %c0_5 = arith.constant 0 : index
    %c0_6 = arith.constant 0 : index
    %5 = vector.load %arg2[%c0_4, %c0_5, %c0_6] : memref<1x4x256xf32, #tpu.memory_space<vmem>>, vector<1x4x256xf32>
    %6 = vector.shape_cast %5 : vector<1x4x256xf32> to vector<4x256xf32>
    %cst = arith.constant dense<0.000000e+00> : vector<32x256xf32>
    %7 = tpu.matmul %3, %6, %cst {dimension_numbers = #tpu.dot_dimension_numbers<[1], [0], [0], [1], [0, 0, 1, 1], [], []>} : vector<32x4xf32>, vector<4x256xf32>, vector<32x256xf32> -> vector<32x256xf32>
    %cst_7 = arith.constant 0.000000e+00 : f32
    %8 = vector.broadcast %cst_7 : f32 to vector<32x256xf32>
    %9 = arith.maximumf %7, %8 : vector<32x256xf32>
    %10 = arith.addf %4, %9 : vector<32x256xf32>
    %c0_8 = arith.constant 0 : index
    %c0_9 = arith.constant 0 : index
    %11 = vector.load %arg6[%c0_8, %c0_9] : memref<32x256xf32, #tpu.memory_space<vmem>>, vector<32x256xf32>
    tpu.vector_store %arg6[%c0_8, %c0_9], %10 {strides = array<i32>} : memref<32x256xf32, #tpu.memory_space<vmem>>, vector<32x256xf32>,
    %c0_10 = arith.constant 0 : index
    %c0_11 = arith.constant 0 : index
    %12 = vector.load %arg7[%c0_10, %c0_11] : memref<32x256xf32, #tpu.memory_space<vmem>>, vector<32x256xf32>
    %c0_12 = arith.constant 0 : index
    %c0_13 = arith.constant 0 : index
    %c0_14 = arith.constant 0 : index
    %13 = vector.load %arg3[%c0_12, %c0_13, %c0_14] : memref<1x4x256xf32, #tpu.memory_space<vmem>>, vector<1x4x256xf32>
    %14 = vector.shape_cast %13 : vector<1x4x256xf32> to vector<4x256xf32>
    %cst_15 = arith.constant dense<0.000000e+00> : vector<32x256xf32>
    %15 = tpu.matmul %3, %14, %cst_15 {dimension_numbers = #tpu.dot_dimension_numbers<[1], [0], [0], [1], [0, 0, 1, 1], [], []>} : vector<32x4xf32>, vector<4x256xf32>, vector<32x256xf32> -> vector<32x256xf32>
    %cst_16 = arith.constant 0.000000e+00 : f32
    %16 = vector.broadcast %cst_16 : f32 to vector<32x256xf32>
    %17 = arith.maximumf %15, %16 : vector<32x256xf32>
    %18 = arith.addf %12, %17 : vector<32x256xf32>
    %c0_17 = arith.constant 0 : index
    %c0_18 = arith.constant 0 : index
    %19 = vector.load %arg7[%c0_17, %c0_18] : memref<32x256xf32, #tpu.memory_space<vmem>>, vector<32x256xf32>
    tpu.vector_store %arg7[%c0_17, %c0_18], %18 {strides = array<i32>} : memref<32x256xf32, #tpu.memory_space<vmem>>, vector<32x256xf32>,
    %c0_i32_19 = arith.constant 0 : i32
    %20 = arith.cmpi eq, %arg1, %c0_i32_19 : i32
    %21 = arith.extui %20 : i1 to i32
    %c0_i32_20 = arith.constant 0 : i32
    %22 = arith.cmpi ne, %21, %c0_i32_20 : i32
    scf.if %22 {
      %c0_21 = arith.constant 0 : index
      %c0_22 = arith.constant 0 : index
      %23 = vector.load %arg6[%c0_21, %c0_22] : memref<32x256xf32, #tpu.memory_space<vmem>>, vector<32x256xf32>
      %cst_23 = arith.constant dense<0.000000e+00> : vector<32xf32>
      %24 = vector.multi_reduction <add>, %23, %cst_23 [1] : vector<32x256xf32> to vector<32xf32>
      %25 = vector.shape_cast %24 : vector<32xf32> to vector<32x1xf32>
      %c0_24 = arith.constant 0 : index
      %c0_25 = arith.constant 0 : index
      %26 = vector.load %arg7[%c0_24, %c0_25] : memref<32x256xf32, #tpu.memory_space<vmem>>, vector<32x256xf32>
      %cst_26 = arith.constant dense<0.000000e+00> : vector<32xf32>
      %27 = vector.multi_reduction <add>, %26, %cst_26 [1] : vector<32x256xf32> to vector<32xf32>
      %28 = vector.shape_cast %27 : vector<32xf32> to vector<32x1xf32>
      %c32 = arith.constant 32 : index
      %c0_27 = arith.constant 0 : index
      %29 = vector.load %arg4[%c32, %c0_27] : memref<104x128xf32, #tpu.memory_space<vmem>>, vector<32x128xf32>
      %c64 = arith.constant 64 : index
      %c0_28 = arith.constant 0 : index
      %30 = vector.load %arg4[%c64, %c0_28] : memref<104x128xf32, #tpu.memory_space<vmem>>, vector<32x128xf32>
      %31 = vector.broadcast %25 : vector<32x1xf32> to vector<32x128xf32>
      %32 = arith.mulf %31, %29 : vector<32x128xf32>
      %cst_29 = arith.constant dense<0.000000e+00> : vector<128xf32>
      %33 = vector.multi_reduction <add>, %32, %cst_29 [0] : vector<32x128xf32> to vector<128xf32>
      %34 = vector.shape_cast %33 : vector<128xf32> to vector<1x128xf32>
      %35 = vector.broadcast %28 : vector<32x1xf32> to vector<32x128xf32>
      %36 = arith.mulf %35, %30 : vector<32x128xf32>
      %cst_30 = arith.constant dense<0.000000e+00> : vector<128xf32>
      %37 = vector.multi_reduction <add>, %36, %cst_30 [0] : vector<32x128xf32> to vector<128xf32>
      %38 = vector.shape_cast %37 : vector<128xf32> to vector<1x128xf32>
      %39 = arith.addf %34, %38 : vector<1x128xf32>
      %cst_31 = arith.constant 3.906250e-03 : f32
      %40 = vector.broadcast %cst_31 : f32 to vector<1x128xf32>
      %41 = arith.mulf %39, %40 : vector<1x128xf32>
      %c96 = arith.constant 96 : index
      %c0_32 = arith.constant 0 : index
      %42 = vector.load %arg4[%c96, %c0_32] : memref<104x128xf32, #tpu.memory_space<vmem>>, vector<1x128xf32>
      %43 = arith.addf %41, %42 : vector<1x128xf32>
      %44 = vector.shape_cast %43 : vector<1x128xf32> to vector<1x1x128xf32>
      %45 = vector.broadcast %44 : vector<1x1x128xf32> to vector<1x8x128xf32>
      %c0_33 = arith.constant 0 : index
      %c0_34 = arith.constant 0 : index
      %c0_35 = arith.constant 0 : index
      %46 = vector.load %arg5[%c0_33, %c0_34, %c0_35] : memref<1x8x128xf32, #tpu.memory_space<vmem>>, vector<1x8x128xf32>
      tpu.vector_store %arg5[%c0_33, %c0_34, %c0_35], %45 {strides = array<i32>} : memref<1x8x128xf32, #tpu.memory_space<vmem>>, vector<1x8x128xf32>,
    } else {
    }
    return
  }
  func.func @transform_0(%arg0: i32, %arg1: i32) -> (i32, i32, i32) {
    %c0_i32 = arith.constant 0 : i32
    %c0_i32_0 = arith.constant 0 : i32
    return %arg0, %c0_i32, %arg1 : i32, i32, i32
  }
  func.func @transform_1(%arg0: i32, %arg1: i32) -> (i32, i32, i32) {
    %c0_i32 = arith.constant 0 : i32
    %c0_i32_0 = arith.constant 0 : i32
    return %arg0, %c0_i32, %arg1 : i32, i32, i32
  }
  func.func @transform_2(%arg0: i32, %arg1: i32) -> (i32, i32) {
    %c0_i32 = arith.constant 0 : i32
    %c0_i32_0 = arith.constant 0 : i32
    %c0_i32_1 = arith.constant 0 : i32
    return %c0_i32, %c0_i32_0 : i32, i32
  }
  func.func @transform_3(%arg0: i32, %arg1: i32) -> (i32, i32, i32) {
    %c0_i32 = arith.constant 0 : i32
    %c0_i32_0 = arith.constant 0 : i32
    %c0_i32_1 = arith.constant 0 : i32
    return %arg0, %c0_i32, %c0_i32_0 : i32, i32, i32
  }
}

</mosaic_0001>

<bundles_post_ra>
// kernel: fwd.1
= control target key start
LH: loop header
LB: loop body
LE: loop exit
PB: predicated region body
PF: predicated region fallthrough
CT: control target
= control target key end

     0   :  { %s796_s12 = smov 0   ;;  %s798_s13 = smov 0   ;;  %s884_s0 = inlined_call_operand.vmem [shape: f32[2,4,256], index: 0, kind: input, shape index: {}]   ;;  %s885_s1 = inlined_call_operand.vmem [shape: f32[2,4,256], index: 1, kind: input, shape index: {}]   ;;  %s886_s2 = inlined_call_operand.vmem [shape: f32[104,128], index: 2, kind: input, shape index: {}]   ;;  %s887_s3 = inlined_call_operand.vmem [shape: f32[2,8,128], index: 3, kind: output, shape index: {}]  }
   0x1   :  { %s800_s14 = smov 0  }
   0x2 LB: > { %s25_s15 = sadd.s32 1, %s769_s13  ;;  %p702_p0 = scmp.ge.s32.totalorder %s773_s14, 1  ;;  %s773_s14 = sphi %s800_s14, %s13_s14   ;;  %s769_s13 = sphi %s798_s13, %s889_s13   ;;  %s765_s12 = sphi %s796_s12, %s888_s12  }
   0x3   : > { %p27_p1 = scmp.ge.s32.totalorder %s25_s15, 2  ;;  %p173_p2 = scmp.lt.s32.totalorder %s773_s14, 3 }
   0x5   : > { %s891_s15 = smov (%p27_p1, %s25_s15), 0  ;;  %p174_p3 = pnand %p702_p0, %p173_p2 }
   0x6   : > { %p210_p4 = scmp.lt.s32.totalorder (!%p174_p3), %s765_s12, 1  ;;  %v775_v0 = vmov (!%p174_p3), 0.0   ;;  %vm281_vm0 = vcmask (!%p174_p3), 1043456   ;;  %v253_v5 = vld [vmem:[%s886_s2] sm:$0xff] (!%p174_p3)  ;;  %vm268_vm1 = vcmask (!%p174_p3), 31744   ;;  %v254_v6 = vld [vmem:[%s886_s2 + $0x8] sm:$0xff] (!%p174_p3) }
   0x7   : > { %177 = sbr.rel (%p174_p3) target bundleno = 419 (0x1a3), region = 32  ;;  %350 = vmatprep.mubr.f32.mxu0 (!%p174_p3), %v775_v0  ;;  %478 = vmatprep.mubr.f32.mxu1 (!%p174_p3), %v775_v0  ;;  %v255_v7 = vld [vmem:[%s886_s2 + $0x10] sm:$0xff] (!%p174_p3)  ;;  %v256_v8 = vld [vmem:[%s886_s2 + $0x18] sm:$0xff] (!%p174_p3)  ;;  %v571_v51 = vld [vmem:[%s886_s2 + $0x28] sm:$0xff] (!%p174_p3) }
   0x8   : > { %v575_v53 = vld [vmem:[%s886_s2 + $0x48] sm:$0xff] (!%p174_p3)  ;;  %v570_v55 = vld [vmem:[%s886_s2 + $0x20] sm:$0xff] (!%p174_p3)  ;;  %v572_v56 = vld [vmem:[%s886_s2 + $0x30] sm:$0xff] (!%p174_p3) }
   0x9   : > { %v574_v57 = vld [vmem:[%s886_s2 + $0x40] sm:$0xff] (!%p174_p3)  ;;  %v576_v59 = vld [vmem:[%s886_s2 + $0x50] sm:$0xff] (!%p174_p3) }
   0xe   : > { %s893_s12 = smov (!%p210_p4, %s765_s12), 1 }
   0xf   : > { %s814_s16 = sshll.u32 %s893_s12, 3 }
  0x10   : > { %s217_s19 = scalar_lea.vmem %s884_s0, %s814_s16  ;;  %s227_s22 = scalar_lea.vmem %s885_s1, %s814_s16 }
  0x11   : > { %v265_v1 = vld [vmem:[%s217_s19] sm:$0xff]  ;;  %s232_s28 = scalar_lea.vmem %s887_s3, %s814_s16 }
  0x12   : > { %v267_v2 = vcombine.high %v265_v1, %v265_v1  ;;  %v407_v3 = vld [vmem:[%s227_s22] sm:$0xff] }
  0x13   : > { %v409_v4 = vcombine.high %v407_v3, %v407_v3 }
  0x14   : > { %708 = vmatprep.subr.msk.mxu0 %vm281_vm0, %v267_v2 }
  0x15   : > { %714 = vmatprep.subr.msk.mxu1 %vm281_vm0, %v409_v4  ;;  %709 = vmatpush1.msk.msra.mxu0 %vm281_vm0, %v265_v1 }
  0x16   : > { %715 = vmatpush1.msk.msra.mxu1 %vm281_vm0, %v407_v3  ;;  %710 = vmatmul.mubr.msk.f32.vlgmr.msra.gmra.mrb[0].mxu0 %vm268_vm1, %v253_v5  ;;  %v573_v3 = vld [vmem:[%s886_s2 + $0x38] sm:$0xff] }
  0x17   : > { %716 = vmatmul.mubr.msk.f32.vlgmr.msra.gmra.mrb[0].mxu1 %vm268_vm1, %v253_v5  ;;  %356 = vmatprep.mubr.f32.mxu0 %v775_v0  ;;  %v577_v5 = vld [vmem:[%s886_s2 + $0x58] sm:$0xff] }
  0x18   : > { %484 = vmatprep.mubr.f32.mxu1 %v775_v0 }
  0x1a   : > { %711 = vmatmul.mubr.msk.f32.gmra.mrb[2].mxu0 %vm268_vm1, %v254_v6 }
  0x1b   : > { %717 = vmatmul.mubr.msk.f32.gmra.mrb[2].mxu1 %vm268_vm1, %v254_v6  ;;  %362 = vmatprep.mubr.f32.mxu0 %v775_v0 }
  0x1c   : > { %490 = vmatprep.mubr.f32.mxu1 %v775_v0 }
  0x1e   : > { %712 = vmatmul.mubr.msk.f32.gmra.mrb[4].mxu0 %vm268_vm1, %v255_v7 }
  0x1f   : > { %718 = vmatmul.mubr.msk.f32.gmra.mrb[4].mxu1 %vm268_vm1, %v255_v7  ;;  %368 = vmatprep.mubr.f32.mxu0 %v775_v0 }
  0x20   : > { %496 = vmatprep.mubr.f32.mxu1 %v775_v0 }
  0x22   : > { %713 = vmatmul.mubr.msk.f32.gmra.mrb[6].mxu0 %vm268_vm1, %v256_v8 }
  0x23   : > { %719 = vmatmul.mubr.msk.f32.gmra.mrb[6].mxu1 %vm268_vm1, %v256_v8 }
  0xe9   : > { %v352_v9 = vpop.f32.mrb[0].mxu0 }
  0xea   : > { %v375_v10 = vmax.f32 %v352_v9, 0.0  ;;  %v480_v11 = vpop.f32.mrb[0].mxu1  ;;  %v354_v12 = vpop.f32.mrb[1].mxu0 }
  0xeb   : > { %v503_v13 = vmax.f32 %v480_v11, 0.0  ;;  %v376_v14 = vmax.f32 %v354_v12, 0.0  ;;  %v482_v15 = vpop.f32.mrb[1].mxu1 }
  0xec   : > { %v504_v16 = vmax.f32 %v482_v15, 0.0 }
  0xed   : > { %v358_v17 = vpop.f32.mrb[2].mxu0  ;;  %v538_v18 = vadd.f32 %v376_v14, %v375_v10 }
  0xee   : > { %v377_v19 = vmax.f32 %v358_v17, 0.0  ;;  %v486_v20 = vpop.f32.mrb[2].mxu1  ;;  %v360_v21 = vpop.f32.mrb[3].mxu0  ;;  %v558_v22 = vadd.f32 %v504_v16, %v503_v13 }
  0xef   : > { %v505_v23 = vmax.f32 %v486_v20, 0.0  ;;  %v378_v24 = vmax.f32 %v360_v21, 0.0  ;;  %v488_v25 = vpop.f32.mrb[3].mxu1  ;;  %539 = vadd.xlane.f32.xlu0 %v538_v18 }
  0xf0   : > { %v506_v26 = vmax.f32 %v488_v25, 0.0  ;;  %559 = vadd.xlane.f32.xlu1 %v558_v22 }
  0xf1   : > { %v364_v27 = vpop.f32.mrb[4].mxu0  ;;  %v541_v28 = vadd.f32 %v378_v24, %v377_v19 }
  0xf2   : > { %v379_v29 = vmax.f32 %v364_v27, 0.0  ;;  %v492_v30 = vpop.f32.mrb[4].mxu1  ;;  %v366_v31 = vpop.f32.mrb[5].mxu0  ;;  %v561_v32 = vadd.f32 %v506_v26, %v505_v23  ;;  %v608_v23 = vlaneseq }
  0xf3   : > { %v507_v33 = vmax.f32 %v492_v30, 0.0  ;;  %v380_v34 = vmax.f32 %v366_v31, 0.0  ;;  %v494_v35 = vpop.f32.mrb[5].mxu1  ;;  %542 = vadd.xlane.f32.xlu0 %v541_v28  ;;  %v606_v30 = vld [vmem:[%s886_s2 + $0x60] sm:$0x1] }
  0xf4   : > { %v508_v36 = vmax.f32 %v494_v35, 0.0  ;;  %562 = vadd.xlane.f32.xlu1 %v561_v32  ;;  %v609_v28 = vshrl.u32 %v608_v23, 7 }
  0xf5   : > { %v370_v37 = vpop.f32.mrb[6].mxu0  ;;  %v544_v38 = vadd.f32 %v380_v34, %v379_v29 }
  0xf6   : > { %v381_v39 = vmax.f32 %v370_v37, 0.0  ;;  %v498_v40 = vpop.f32.mrb[6].mxu1  ;;  %v372_v41 = vpop.f32.mrb[7].mxu0  ;;  %v564_v42 = vadd.f32 %v508_v36, %v507_v33  ;;  %v610_v31 = vsub.s32 0, %v609_v28 }
  0xf7   : > { %v509_v43 = vmax.f32 %v498_v40, 0.0  ;;  %v382_v44 = vmax.f32 %v372_v41, 0.0  ;;  %v500_v45 = vpop.f32.mrb[7].mxu1  ;;  %545 = vadd.xlane.f32.xlu0 %v544_v38 }
  0xf8   : > { %v510_v46 = vmax.f32 %v500_v45, 0.0  ;;  %565 = vadd.xlane.f32.xlu1 %v564_v42 }
  0xf9   : > { %v547_v47 = vadd.f32 %v382_v44, %v381_v39 }
  0xfa   : > { %v567_v48 = vadd.f32 %v510_v46, %v509_v43 }
  0xfb   : > { %548 = vadd.xlane.f32.xlu0 %v547_v47 }
  0xfc   : > { %568 = vadd.xlane.f32.xlu1 %v567_v48 }
 0x17c   : > { %v540_v49 = vpop.xlane.xlu0 %539 }
 0x17d   : > { %v560_v50 = vpop.xlane.xlu1 %559  ;;  %v578_v62 = vmul.f32 %v570_v55, %v540_v49 }
 0x17e   : > { %v591_v1 = vmul.f32 %v574_v57, %v560_v50 }
 0x180   : > { %v543_v52 = vpop.xlane.xlu0 %542 }
 0x181   : > { %v563_v54 = vpop.xlane.xlu1 %562  ;;  %v579_v58 = vmul.f32 %v571_v51, %v543_v52 }
 0x182   : > { %v592_v60 = vmul.f32 %v575_v53, %v563_v54 }
 0x183   : > { %v582_v4 = vadd.f32 %v579_v58, %v578_v62 }
 0x184   : > { %v546_v61 = vpop.xlane.xlu0 %545  ;;  %v595_v6 = vadd.f32 %v592_v60, %v591_v1 }
 0x185   : > { %v566_v63 = vpop.xlane.xlu1 %565  ;;  %v580_v0 = vmul.f32 %v572_v56, %v546_v61 }
 0x186   : > { %v593_v2 = vmul.f32 %v576_v59, %v566_v63 }
 0x187   : > { %v583_v8 = vadd.f32 %v582_v4, %v580_v0 }
 0x188   : > { %v549_v7 = vpop.xlane.xlu0 %548  ;;  %v596_v11 = vadd.f32 %v595_v6, %v593_v2 }
 0x189   : > { %v569_v9 = vpop.xlane.xlu1 %568  ;;  %v581_v10 = vmul.f32 %v573_v3, %v549_v7 }
 0x18a   : > { %v594_v12 = vmul.f32 %v577_v5, %v569_v9 }
 0x18b   : > { %v584_v13 = vadd.f32 %v583_v8, %v581_v10 }
 0x18c   : > { %v597_v14 = vadd.f32 %v596_v11, %v594_v12 }
 0x18d   : > { %v585_v15 = vrot.slane %v584_v13, 4 }
 0x18e   : > { %v598_v16 = vrot.slane %v597_v14, 4 }
 0x18f   : > { %v586_v17 = vadd.f32 %v585_v15, %v584_v13 }
 0x190   : > { %v599_v18 = vadd.f32 %v598_v16, %v597_v14 }
 0x191   : > { %v587_v19 = vrot.slane %v586_v17, 2 }
 0x192   : > { %v600_v20 = vrot.slane %v599_v18, 2 }
 0x193   : > { %v588_v21 = vadd.f32 %v587_v19, %v586_v17 }
 0x194   : > { %v601_v22 = vadd.f32 %v600_v20, %v599_v18 }
 0x195   : > { %v589_v24 = vrot.slane %v588_v21, 1 }
 0x196   : > { %v602_v25 = vrot.slane %v601_v22, 1 }
 0x197   : > { %v590_v26 = vadd.f32 %v589_v24, %v588_v21 }
 0x198   : > { %v603_v27 = vadd.f32 %v602_v25, %v601_v22 }
 0x19a   : > { %v604_v29 = vadd.f32 %v603_v27, %v590_v26 }
 0x19c   : > { %v605_v32 = vmul.f32 0.00390625, %v604_v29 }
 0x19e   : > { %v607_v33 = vadd.f32 %v606_v30, %v605_v32 }
 0x1a0   : > { %v611_v34 = vrot.slane %v607_v33, %v610_v31 }
 0x1a2   : > { %612 = vst [vmem:[%s232_s28] sm:$0xff] %v611_v34 }
 0x1a3 PF: > { %s13_s14 = sadd.s32 1, %s773_s14   ;;  %s888_s12 = smov %s769_s13 }
 0x1a4   : > { %p10_p5 = scmp.ge.s32.totalorder %s13_s14, 4   ;;  %s889_s13 = smov %s891_s15 }
 0x1a6   :  { %12 = sbr.rel (!%p10_p5) target bundleno = 2 (0x2), region = 73 }

</bundles_post_ra>
